<compile_context>
chip_gen: v5e
topology: v5e:2x2
jax: 0.10.0
libtpu: 0.0.40
codegen_flags: <defaults>
</compile_context>

<pallas_src>
import functools

import jax
import jax.numpy as jnp
from jax.experimental import pallas as pl
from jax.experimental.pallas import tpu as pltpu


_SINGLE_TILE_BUDGET = 16 << 20   # VMEM budget for the single-tile fast path
_TILED_VMEM_BUDGET = 20 << 20    # VMEM budget for the tiled path (< 32 MiB scoped default)


def _round_up(x, m):
    return (x + m - 1) // m * m


def _cdiv(a, b):
    return -(-a // b)


def _pow_gamma(x, gamma):
    """x ** gamma; small non-negative integer gamma is unrolled on the VALU."""
    g = float(gamma)
    if g == int(g) and 0 <= int(g) <= 8:
        gi = int(g)
        if gi == 0:
            return jnp.ones_like(x)
        r = x
        for _ in range(gi - 1):
            r = r * x
        return r
    return x ** jnp.float32(g)


def _focal_small_kernel(*refs, gamma, has_alpha, reduction):
    """Single-tile path: whole problem in one block, (N, C) layout."""
    if has_alpha:
        logits_ref, target_ref, alpha_ref, out_ref = refs
    else:
        logits_ref, target_ref, out_ref = refs
        alpha_ref = None

    x = logits_ref[...].astype(jnp.float32)            # (N, C)
    tgt = target_ref[...]                              # (N, 1) int32
    n, c = x.shape

    class_ids = jax.lax.broadcasted_iota(jnp.int32, (n, c), 1)
    onehot = (class_ids == tgt).astype(jnp.float32)    # (N, C)

    # numerically-stable logsumexp over classes
    m = jnp.max(x, axis=1, keepdims=True)              # (N, 1)
    lse = m + jnp.log(jnp.sum(jnp.exp(x - m), axis=1, keepdims=True))
    tgt_logit = jnp.sum(x * onehot, axis=1, keepdims=True)
    ce = lse - tgt_logit                                # (N, 1)

    pt = jnp.exp(-ce)
    focal = _pow_gamma(jnp.maximum(1.0 - pt, 0.0), gamma) * ce

    if has_alpha:
        af = jnp.sum(alpha_ref[...].astype(jnp.float32) * onehot,
                     axis=1, keepdims=True)
        focal = af * focal

    if reduction == "none":
        out_ref[...] = focal                            # (N, 1)
    else:
        total = jnp.sum(focal, axis=0, keepdims=True)   # (1, 1)
        lane = jax.lax.broadcasted_iota(jnp.int32, (1, 128), 1)
        out_ref[...] = jnp.where(lane == 0, total, 0.0)  # (1, 128) lane-dense


def _focal_tiled_kernel(*refs, gamma, has_alpha, reduction, n_valid, tile_n):
    """Tiled path: (TILE_N, C) block -> in-kernel transpose -> dense (C, TILE_N)."""
    if has_alpha:
        logits_ref, target_ref, alpha_ref, out_ref = refs
    else:
        logits_ref, target_ref, out_ref = refs
        alpha_ref = None

    x_nc = logits_ref[...].astype(jnp.float32)          # (T, C) lane-sparse
    x = x_nc.T                                          # (C, T) lane-dense (one XLU transpose)
    tgt = target_ref[...]                               # (1, T) int32, lane-dense
    c, t = x.shape

    # Mask columns past the valid range (last, partial tile): scrub possible
    # OOB garbage before exp/log so every intermediate stays finite.
    col = pl.program_id(0) * tile_n + jax.lax.broadcasted_iota(jnp.int32, (1, t), 1)
    valid = col < n_valid
    x = jnp.where(valid, x, 0.0)

    class_ids = jax.lax.broadcasted_iota(jnp.int32, (c, t), 0)
    onehot = (class_ids == tgt).astype(jnp.float32)     # (C, T)

    m = jnp.max(x, axis=0, keepdims=True)               # (1, T)
    lse = m + jnp.log(jnp.sum(jnp.exp(x - m), axis=0, keepdims=True))
    tgt_logit = jnp.sum(x * onehot, axis=0, keepdims=True)
    ce = lse - tgt_logit                                 # (1, T)

    pt = jnp.exp(-ce)
    focal = _pow_gamma(jnp.maximum(1.0 - pt, 0.0), gamma) * ce

    if has_alpha:
        af = jnp.sum(alpha_ref[...].astype(jnp.float32) * onehot,
                     axis=0, keepdims=True)
        focal = af * focal

    focal = jnp.where(valid, focal, 0.0)

    if reduction == "none":
        out_ref[...] = focal                              # (1, T) lane-dense store
    else:
        part = jnp.sum(focal, axis=1, keepdims=True)      # (1, 1) per-tile partial
        lane = jax.lax.broadcasted_iota(jnp.int32, (1, 128), 1)
        out_ref[...] = jnp.where(lane == 0, part, 0.0)    # (1, 128) lane-dense


def focal_loss(logits, target, *, gamma=2, alpha=None, reduction="mean",
               tile_n=None, _force_tiled=False):
    """Pallas TPU implementation of FocalLoss.forward.

    logits: (N, C) float array, target: (N,) int array.
    """
    logits = jnp.asarray(logits)
    n, c = logits.shape
    target_i = jnp.asarray(target, jnp.int32)
    has_alpha = alpha is not None
    alpha_arr = jnp.asarray(alpha, jnp.float32).reshape(-1) if has_alpha else None

    padded_c = _round_up(c, 128)                 # minor-dim lane padding in VMEM
    in_bytes = jnp.dtype(logits.dtype).itemsize

    params = pltpu.CompilerParams(dimension_semantics=("parallel",))

    # ------------------------------------------------------------------ #
    # Small-N fast path: single grid step, no masking, fused reduction.
    # ------------------------------------------------------------------ #
    small_max = max(256, min(4096, _SINGLE_TILE_BUDGET // (padded_c * 4 * 7)))
    if n <= small_max and not _force_tiled:
        kern = functools.partial(_focal_small_kernel, gamma=gamma,
                                 has_alpha=has_alpha, reduction=reduction)
        in_specs = [pl.BlockSpec((n, c), lambda i: (0, 0)),
                    pl.BlockSpec((n, 1), lambda i: (0, 0))]
        args = [logits, target_i.reshape(n, 1)]
        if has_alpha:
            in_specs.append(pl.BlockSpec((1, c), lambda i: (0, 0)))
            args.append(alpha_arr.reshape(1, c))

        if reduction == "none":
            out_spec = pl.BlockSpec((n, 1), lambda i: (0, 0))
            out_shape = jax.ShapeDtypeStruct((n, 1), jnp.float32)
        else:
            out_spec = pl.BlockSpec((1, 128), lambda i: (0, 0))
            out_shape = jax.ShapeDtypeStruct((1, 128), jnp.float32)

        out = pl.pallas_call(kern, grid=(1,), in_specs=in_specs,
                             out_specs=out_spec, out_shape=out_shape,
                             compiler_params=params)(*args)
        if reduction == "mean":
            return jnp.sum(out) / jnp.float32(n)
        if reduction == "sum":
            return jnp.sum(out)
        return out.reshape(n)

    # ------------------------------------------------------------------ #
    # Tiled path: grid over N, in-kernel transpose, per-tile partial sums.
    # ------------------------------------------------------------------ #
    if tile_n is None:
        # VMEM estimate per sample-row: 2x double-buffered (lane-padded) input
        # + one lane-padded f32 upcast copy + dense (C, T) f32 temporaries.
        per_row = 2 * padded_c * in_bytes + padded_c * 4 + 8 * c * 4 + 64
        tile = _TILED_VMEM_BUDGET // per_row
    else:
        tile = int(tile_n)
    tile = max(128, min(int(tile), 16384) // 128 * 128)
    tile = min(tile, max(128, (n // 128) * 128))          # never exceed the array
    if _cdiv(n, tile) < 2 and n >= 256:                   # keep both v7x TCs busy
        tile = min(tile, max(128, _round_up(_cdiv(n, 2), 128)))
    num_tiles = _cdiv(n, tile)

    kern = functools.partial(_focal_tiled_kernel, gamma=gamma,
                             has_alpha=has_alpha, reduction=reduction,
                             n_valid=n, tile_n=tile)
    in_specs = [pl.BlockSpec((tile, c), lambda i: (i, 0)),     # logits tile
                pl.BlockSpec((1, tile), lambda i: (0, i))]     # target, lane-dense
    args = [logits, target_i.reshape(1, n)]
    if has_alpha:
        in_specs.append(pl.BlockSpec((c, 1), lambda i: (0, 0)))  # resident alpha
        args.append(alpha_arr.reshape(c, 1))

    if reduction == "none":
        out_spec = pl.BlockSpec((1, tile), lambda i: (0, i))
        out_shape = jax.ShapeDtypeStruct((1, n), jnp.float32)
    else:
        out_spec = pl.BlockSpec((1, 128), lambda i: (0, i))
        out_shape = jax.ShapeDtypeStruct((1, 128 * num_tiles), jnp.float32)

    out = pl.pallas_call(kern, grid=(num_tiles,), in_specs=in_specs,
                         out_specs=out_spec, out_shape=out_shape,
                         compiler_params=params)(*args)
    if reduction == "mean":
        return jnp.sum(out) / jnp.float32(n)
    if reduction == "sum":
        return jnp.sum(out)
    return out.reshape(n)


def _focal_loss_ref(logits, target, *, gamma=2, alpha=None, reduction="mean"):
    """Plain-JAX reference mirroring the PyTorch semantics."""
    logp = jax.nn.log_softmax(logits.astype(jnp.float32), axis=-1)
    ce = -jnp.take_along_axis(logp, target[:, None].astype(jnp.int32), axis=-1)[:, 0]
    pt = jnp.exp(-ce)
    focal = (1.0 - pt) ** gamma * ce
    if alpha is not None:
        focal = jnp.asarray(alpha, jnp.float32)[target] * focal
    if reduction == "mean":
        return focal.mean()
    if reduction == "sum":
        return focal.sum()
    return focal


if __name__ == "__main__":
    key = jax.random.PRNGKey(0)
    k1, k2, k3, k4, k5, k6 = jax.random.split(key, 6)

    # Small shapes consistent with the module: 8 samples, 16 classes.
    N, C = 8, 16
    logits = jax.random.normal(k1, (N, C), dtype=jnp.float32)
    target = jax.random.randint(k2, (N,), 0, C, dtype=jnp.int32)
    alpha = [0.5 + 0.05 * i for i in range(C)]

    # default module config: gamma=2, alpha=None, reduction='mean'
    out = jax.block_until_ready(focal_loss(logits, target, gamma=2,
                                           alpha=None, reduction="mean"))
    ref = _focal_loss_ref(logits, target, gamma=2, alpha=None, reduction="mean")
    assert jnp.allclose(out, ref, rtol=1e-5, atol=1e-5), (out, ref)

    # alpha-weighted, reduction='none'
    out2 = jax.block_until_ready(focal_loss(logits, target, gamma=2,
                                            alpha=alpha, reduction="none"))
    ref2 = _focal_loss_ref(logits, target, gamma=2, alpha=alpha, reduction="none")
    assert jnp.allclose(out2, ref2, rtol=1e-5, atol=1e-5)

    # alpha-weighted, reduction='sum'
    out3 = jax.block_until_ready(focal_loss(logits, target, gamma=2,
                                            alpha=alpha, reduction="sum"))
    ref3 = _focal_loss_ref(logits, target, gamma=2, alpha=alpha, reduction="sum")
    assert jnp.allclose(out3, ref3, rtol=1e-5, atol=1e-5)

    # ragged N (not a multiple of 8/128) through the single-tile fast path
    N2 = 300
    logits_b = jax.random.normal(k3, (N2, C), dtype=jnp.float32)
    target_b = jax.random.randint(k4, (N2,), 0, C, dtype=jnp.int32)
    out4 = jax.block_until_ready(focal_loss(logits_b, target_b, gamma=2,
                                            alpha=alpha, reduction="mean"))
    ref4 = _focal_loss_ref(logits_b, target_b, gamma=2, alpha=alpha,
                           reduction="mean")
    assert jnp.allclose(out4, ref4, rtol=1e-5, atol=1e-5), (out4, ref4)

    # exercise the tiled (large-N) path at a small, fast scale: multi-tile grid,
    # ragged last tile, in-kernel transpose, fused per-tile partial sums.
    N3 = 1000
    logits_c = jax.random.normal(k5, (N3, C), dtype=jnp.float32)
    target_c = jax.random.randint(k6, (N3,), 0, C, dtype=jnp.int32)
    out5 = jax.block_until_ready(focal_loss(logits_c, target_c, gamma=2,
                                            alpha=alpha, reduction="mean",
                                            tile_n=512, _force_tiled=True))
    ref5 = _focal_loss_ref(logits_c, target_c, gamma=2, alpha=alpha,
                           reduction="mean")
    assert jnp.allclose(out5, ref5, rtol=1e-5, atol=1e-5), (out5, ref5)

    out6 = jax.block_until_ready(focal_loss(logits_c, target_c, gamma=2,
                                            alpha=None, reduction="none",
                                            tile_n=512, _force_tiled=True))
    ref6 = _focal_loss_ref(logits_c, target_c, gamma=2, alpha=None,
                           reduction="none")
    assert jnp.allclose(out6, ref6, rtol=1e-5, atol=1e-5)

    print("KERNEL_OK")
</pallas_src>

<mosaic_0001>
module attributes {stable_mosaic.version = 11 : i64} {
  func.func @_focal_small_kernel(%arg0: i32, %arg1: memref<8x16xf32, #tpu.memory_space<vmem>>, %arg2: memref<8x1xi32, #tpu.memory_space<vmem>>, %arg3: memref<1x128xf32, #tpu.memory_space<vmem>>) attributes {dimension_semantics = [#tpu.dimension_semantics<parallel>], iteration_bounds = array<i64: 1>, scalar_prefetch = 0 : i64, scratch_operands = 0 : i64, tpu.core_type = #tpu.core_type<tc>, window_params = [{pipeline_mode = #tpu.pipeline_mode<synchronous>, transform_indices = @transform_0, window_bounds = array<i64: 8, 16>}, {pipeline_mode = #tpu.pipeline_mode<synchronous>, transform_indices = @transform_1, window_bounds = array<i64: 8, 1>}, {pipeline_mode = #tpu.pipeline_mode<synchronous>, transform_indices = @transform_2, window_bounds = array<i64: 1, 128>}]} {
    %c0 = arith.constant 0 : index
    %c0_0 = arith.constant 0 : index
    %0 = vector.load %arg1[%c0, %c0_0] : memref<8x16xf32, #tpu.memory_space<vmem>>, vector<8x16xf32>
    %c0_1 = arith.constant 0 : index
    %c0_2 = arith.constant 0 : index
    %1 = vector.load %arg2[%c0_1, %c0_2] : memref<8x1xi32, #tpu.memory_space<vmem>>, vector<8x1xi32>
    %2 = tpu.iota {dimensions = array<i32: 1>} : vector<8x16xi32>
    %3 = vector.broadcast %1 : vector<8x1xi32> to vector<8x16xi32>
    %4 = arith.cmpi eq, %2, %3 : vector<8x16xi32>
    %5 = arith.extui %4 : vector<8x16xi1> to vector<8x16xi32>
    %6 = arith.sitofp %5 : vector<8x16xi32> to vector<8x16xf32>
    %cst = arith.constant dense<0xFF800000> : vector<8xf32>
    %7 = vector.multi_reduction <maximumf>, %0, %cst [1] : vector<8x16xf32> to vector<8xf32>
    %8 = vector.shape_cast %7 : vector<8xf32> to vector<8x1xf32>
    %9 = vector.broadcast %8 : vector<8x1xf32> to vector<8x16xf32>
    %10 = arith.subf %0, %9 : vector<8x16xf32>
    %11 = math.exp %10 : vector<8x16xf32>
    %cst_3 = arith.constant dense<0.000000e+00> : vector<8xf32>
    %12 = vector.multi_reduction <add>, %11, %cst_3 [1] : vector<8x16xf32> to vector<8xf32>
    %13 = vector.shape_cast %12 : vector<8xf32> to vector<8x1xf32>
    %14 = math.log %13 : vector<8x1xf32>
    %15 = arith.addf %8, %14 : vector<8x1xf32>
    %16 = arith.mulf %0, %6 : vector<8x16xf32>
    %cst_4 = arith.constant dense<0.000000e+00> : vector<8xf32>
    %17 = vector.multi_reduction <add>, %16, %cst_4 [1] : vector<8x16xf32> to vector<8xf32>
    %18 = vector.shape_cast %17 : vector<8xf32> to vector<8x1xf32>
    %19 = arith.subf %15, %18 : vector<8x1xf32>
    %cst_5 = arith.constant 0.000000e+00 : f32
    %20 = vector.broadcast %cst_5 : f32 to vector<8x1xf32>
    %21 = arith.subf %20, %19 : vector<8x1xf32>
    %22 = math.exp %21 : vector<8x1xf32>
    %cst_6 = arith.constant 1.000000e+00 : f32
    %23 = vector.broadcast %cst_6 : f32 to vector<8x1xf32>
    %24 = arith.subf %23, %22 : vector<8x1xf32>
    %cst_7 = arith.constant 0.000000e+00 : f32
    %25 = vector.broadcast %cst_7 : f32 to vector<8x1xf32>
    %26 = arith.maximumf %24, %25 : vector<8x1xf32>
    %27 = arith.mulf %26, %26 : vector<8x1xf32>
    %28 = arith.mulf %27, %19 : vector<8x1xf32>
    %cst_8 = arith.constant dense<0.000000e+00> : vector<1xf32>
    %29 = vector.multi_reduction <add>, %28, %cst_8 [0] : vector<8x1xf32> to vector<1xf32>
    %30 = vector.shape_cast %29 : vector<1xf32> to vector<1x1xf32>
    %31 = tpu.iota {dimensions = array<i32: 1>} : vector<1x128xi32>
    %c0_i32 = arith.constant 0 : i32
    %32 = vector.broadcast %c0_i32 : i32 to vector<1x128xi32>
    %33 = arith.cmpi eq, %31, %32 : vector<1x128xi32>
    %cst_9 = arith.constant 0.000000e+00 : f32
    %34 = vector.shape_cast %30 : vector<1x1xf32> to vector<1x1xf32>
    %35 = vector.broadcast %34 : vector<1x1xf32> to vector<1x128xf32>
    %36 = vector.broadcast %cst_9 : f32 to vector<1x128xf32>
    %37 = arith.select %33, %35, %36 : vector<1x128xi1>, vector<1x128xf32>
    %c0_10 = arith.constant 0 : index
    %c0_11 = arith.constant 0 : index
    %38 = vector.load %arg3[%c0_10, %c0_11] : memref<1x128xf32, #tpu.memory_space<vmem>>, vector<1x128xf32>
    tpu.vector_store %arg3[%c0_10, %c0_11], %37 {strides = array<i32>} : memref<1x128xf32, #tpu.memory_space<vmem>>, vector<1x128xf32>,
    return
  }
  func.func @transform_0(%arg0: i32) -> (i32, i32) {
    %c0_i32 = arith.constant 0 : i32
    %c0_i32_0 = arith.constant 0 : i32
    %c0_i32_1 = arith.constant 0 : i32
    return %c0_i32, %c0_i32_0 : i32, i32
  }
  func.func @transform_1(%arg0: i32) -> (i32, i32) {
    %c0_i32 = arith.constant 0 : i32
    %c0_i32_0 = arith.constant 0 : i32
    %c0_i32_1 = arith.constant 0 : i32
    return %c0_i32, %c0_i32_0 : i32, i32
  }
  func.func @transform_2(%arg0: i32) -> (i32, i32) {
    %c0_i32 = arith.constant 0 : i32
    %c0_i32_0 = arith.constant 0 : i32
    %c0_i32_1 = arith.constant 0 : i32
    return %c0_i32, %c0_i32_0 : i32, i32
  }
}

</mosaic_0001>

<bundles_post_ra>
// kernel: tpu_custom_call.1
= control target key start
LH: loop header
LB: loop body
LE: loop exit
PB: predicated region body
PF: predicated region fallthrough
CT: control target
= control target key end

     0   :  { %vm22_vm0 = vcmask 130048   ;;  %s139_s0 = inlined_call_operand.vmem [shape: f32[8,16], index: 0, kind: input, shape index: {}]   ;;  %s140_s1 = inlined_call_operand.vmem [shape: s32[8,1], index: 1, kind: input, shape index: {}]   ;;  %s141_s2 = inlined_call_operand.hbm [shape: f32[1,128], index: 2, kind: output, shape index: {}]  }
   0x1   :  { %v12_v0 = vld [vmem:[%s139_s0] sm:$0xff] }
   0x2   :  { %7 = vsyncpa [#allocation3], 0  ;;  %v23_v1 = vsel %vm22_vm0, %v12_v0, -inf  ;;  %v109_v2 = vmov 0   ;;  %v13_v3 = vld [vmem:[%s140_s1] sm:$0xff]  ;;  %v14_v9 = vlaneseq  ;;  %v110_v12 = vmov 0.0  }
   0x3   :  { %76 = vset.pattern.permute.xlu0 %v109_v2  ;;  %s111_s0 = smov [#allocation2]   ;;  %s63_s15 = sshll.u32 %s141_s2, 4  ;;  %s64_s15 = int_to_ptr.hbm [resolvable:$true] %s63_s15 }
   0x4   :  { %24 = vmax.xlane.f32.xlu0 %v23_v1  ;;  %v15_v10 = vand.u32 127, %v14_v9  ;;  %s61_s1 = sshll.u32 %s111_s0, 4  ;;  %s62_s1 = int_to_ptr.vmem [resolvable:$true] %s61_s1 }
   0x6   :  { %vm53_vm2 = vcmp.eq.s32.totalorder %v15_v10, 0 }
  0x18   :  { %17 = vperm.xlu0 %76, %v13_v3  }
  0x77   :  { %v25_v4 = vpop.xlane.xlu0 %24 }
  0x78   :  { %v26_v5 = vsub.f32 %v12_v0, %v25_v4 }
  0x7a   :  { %v27_v6 = vmul.f32 1.442695, %v26_v5 }
  0x7c   :  { %77 = vpow2.f32 %v27_v6 }
  0x82   :  { %v78_v7 = vpop.eup %77 }
  0x83   :  { %v29_v8 = vsel %vm22_vm0, %v78_v7, 0.0 }
  0x84   :  { %30 = vadd.xlane.f32.xlu1 %v29_v8 }
  0x8a   :  { %v18_v11 = vpop.permute.xlu0 %17 }
  0x8b   :  { %vm19_vm1 = vcmp.eq.s32.totalorder %v15_v10, %v18_v11 }
  0x8c   :  { %v72_v13 = vsel %vm19_vm1, 1.0, %v110_v12 }
  0x8d   :  { %v35_v14 = vmul.f32 %v72_v13, %v12_v0 }
  0x8f   :  { %v36_v15 = vsel %vm22_vm0, %v35_v14, 0.0 }
  0x90   :  { %37 = vadd.xlane.f32.xlu1 %v36_v15 }
  0xf7   :  { %v31_v16 = vpop.xlane.xlu1 %30 }
  0xf8   :  { %79 = vlog2.f32 %v31_v16 }
  0xfe   :  { %v80_v17 = vpop.eup %79 }
  0xff   :  { %v33_v18 = vmul.f32 0.6931472, %v80_v17 }
 0x101   :  { %v34_v19 = vadd.f32 %v33_v18, %v25_v4 }
 0x103   :  { %v38_v20 = vpop.xlane.xlu1 %37 }
 0x104   :  { %v39_v21 = vsub.f32 %v34_v19, %v38_v20 }
 0x106   :  { %v40_v22 = vsub.f32 0.0, %v39_v21 }
 0x108   :  { %v41_v23 = vmul.f32 1.442695, %v40_v22 }
 0x10a   :  { %81 = vpow2.f32 %v41_v23 }
 0x110   :  { %v82_v24 = vpop.eup %81 }
 0x111   :  { %v43_v25 = vsub.f32 1.0, %v82_v24 }
 0x113   :  { %v44_v26 = vmax.f32 %v43_v25, 0.0 }
 0x115   :  { %v45_v27 = vmul.f32 %v44_v26, %v44_v26 }
 0x117   :  { %v46_v28 = vmul.f32 %v45_v27, %v39_v21 }
 0x119   :  { %v47_v29 = vrot.slane %v46_v28, 4 }
 0x11b   :  { %v48_v30 = vadd.f32 %v47_v29, %v46_v28 }
 0x11d   :  { %v49_v31 = vrot.slane %v48_v30, 2 }
 0x11f   :  { %v50_v32 = vadd.f32 %v49_v31, %v48_v30 }
 0x121   :  { %v51_v33 = vrot.slane %v50_v32, 1 }
 0x123   :  { %v52_v34 = vadd.f32 %v51_v33, %v50_v32 }
 0x125   :  { %v54_v35 = vsel %vm53_vm2, %v52_v34, 0.0 }
 0x126   :  { %55 = vst [vmem:[#allocation2] sm:$0x1] %v54_v35 }
 0x127   :  { %66 = dma.vmem_to_hbm [thread:$0]  %s62_s1, 16, %s64_s15, [#allocation3]  }
 0x128   :  { %107 = dma.done.wait [#allocation3], 16  }
 0x129   :  { %108 = vsyncadd [#allocation3], 4294967280 }
 0x12a   :  { %71 = vsyncpa [#allocation3], 1 }

</bundles_post_ra>
